<compile_context>
chip_gen: v7x
topology: tpu7x:2x2x1
jax: 0.10.0
libtpu: 0.0.40
codegen_flags: <defaults>
</compile_context>

<pallas_src>
import numpy as np
import jax
import jax.numpy as jnp
from jax.experimental import pallas as pl
from jax.experimental.pallas import tpu as pltpu

LANE = 128        # padded class dimension (lane width)
GAMMA = 2.0       # focal-loss focusing parameter
NEG_INF = -1e30   # finite "minus infinity" for padded class lanes

# Canonical head order used by the stacked kernel inputs/outputs:
#   0 id, 1 gender, 2 da_gender, 3 facial_hair, 4 da_facial_hair,
#   5 spectacles, 6 da_spectacles, 7 emotion, 8 da_emotion,
#   9 pose, 10 da_pose, 11 occlusion, 12 da_occlusion
_HEAD_ALPHA_KEYS = ('id', 'gender', 'gender', 'facial_hair', 'facial_hair',
                    'spectacles', 'spectacles', 'emotion', 'emotion',
                    'pose', 'pose', 'occlusion', 'occlusion')
# y columns: [id, gender, spectacles, facial_hair, pose, occlusion, emotion]
_HEAD_LABEL_COLS = np.asarray([0, 1, 1, 3, 3, 2, 2, 6, 6, 4, 4, 5, 5], np.int32)
NUM_HEADS = len(_HEAD_ALPHA_KEYS)


# ----------------------------- Pallas kernel ------------------------------- #
def focal_loss_kernel(logits_ref, labels_ref, alpha_ref, out_ref):
    """Single grid step: all 13 heads at once.

    logits_ref: [H, B, C] f32  (padded class lanes hold NEG_INF)
    labels_ref: [H, B, 1] i32
    alpha_ref : [H, 1, C] f32  (padded class lanes hold 0)
    out_ref   : [H, 1, C] f32  (per-head mean loss broadcast over lanes)
    """
    x = logits_ref[...]                    # [H, B, C]
    lbl = labels_ref[...]                  # [H, B, 1]
    alpha = alpha_ref[...]                 # [H, 1, C]

    # numerically stable softmax pieces (class axis == lanes)
    m = jnp.max(x, axis=-1, keepdims=True)         # [H, B, 1]
    z = x - m
    ez = jnp.exp(z)
    sum_ez = jnp.sum(ez, axis=-1, keepdims=True)   # [H, B, 1]

    # select+reduce gather of the target class (no float one-hot / full logp)
    cls = jax.lax.broadcasted_iota(jnp.int32, x.shape, 2)        # built once
    mask = cls == lbl                                            # [H, B, C]
    z_t = jnp.sum(jnp.where(mask, z, 0.0), axis=-1, keepdims=True)
    ez_t = jnp.sum(jnp.where(mask, ez, 0.0), axis=-1, keepdims=True)
    alpha_b = jnp.broadcast_to(alpha, x.shape)
    alpha_t = jnp.sum(jnp.where(mask, alpha_b, 0.0), axis=-1, keepdims=True)

    logpt = z_t - jnp.log(sum_ez)          # log p_target
    pt = ez_t / sum_ez                     # == exp(logpt), one fewer EUP exp

    one_minus_pt = 1.0 - pt
    if GAMMA == 2.0:
        mod = one_minus_pt * one_minus_pt
    else:
        mod = jnp.power(one_minus_pt, GAMMA)
    loss = -alpha_t * mod * logpt                                # [H, B, 1]

    inv_b = 1.0 / x.shape[1]               # mean over the (unpadded) batch
    mean_loss = jnp.sum(loss, axis=1, keepdims=True) * inv_b     # [H, 1, 1]
    out_ref[...] = jnp.broadcast_to(mean_loss, out_ref.shape).astype(out_ref.dtype)


def focal_losses_pallas(logits_stack, labels_stack, alpha_stack):
    """[H,B,C] f32, [H,B,1] i32, [H,1,C] f32 -> per-head mean losses [H]."""
    H, B, C = logits_stack.shape
    out = pl.pallas_call(
        focal_loss_kernel,
        out_shape=jax.ShapeDtypeStruct((H, 1, C), jnp.float32),
        grid_spec=pltpu.PrefetchScalarGridSpec(
            num_scalar_prefetch=0,
            grid=(1,),                       # one step: no per-head overhead
            in_specs=[
                pl.BlockSpec((H, B, C), lambda i: (0, 0, 0)),
                pl.BlockSpec((H, B, 1), lambda i: (0, 0, 0)),
                pl.BlockSpec((H, 1, C), lambda i: (0, 0, 0)),
            ],
            out_specs=pl.BlockSpec((H, 1, C), lambda i: (0, 0, 0)),
        ),
        compiler_params=pltpu.CompilerParams(
            dimension_semantics=("arbitrary",)),
    )(logits_stack, labels_stack, alpha_stack)
    return out[:, 0, 0]


# ------------------------------ glue / wrapper ----------------------------- #
def _stack_and_pad(group):
    """Stack same-class-count heads and pad the class axis to LANE once."""
    g = jnp.stack([x.astype(jnp.float32) for x in group], axis=0)  # [n, B, c]
    c = g.shape[-1]
    return jnp.pad(g, ((0, 0), (0, 0), (0, LANE - c)), constant_values=NEG_INF)


def _build_alpha_stack(alphas):
    """Static per-head alpha table -> compile-time constant [H, 1, LANE]."""
    a = np.zeros((NUM_HEADS, 1, LANE), np.float32)
    for h, k in enumerate(_HEAD_ALPHA_KEYS):
        v = np.asarray(alphas[k], np.float32)
        a[h, 0, :v.shape[0]] = v
    return jnp.asarray(a)


def multi_task_loss(logits, y, loss_weight, alphas):
    """Mirror of MultiTaskLoss.forward; `y` is [B, 7] int32."""
    ((x_spectacles, x_da_spectacles), (x_occlusion, x_da_occlusion),
     (x_facial_hair, x_da_facial_hair), (x_pose, x_da_pose),
     (x_emotion, x_da_emotion), (x_gender, x_da_gender), x_id) = logits

    # Group heads by class count: 3 pads + 1 concat instead of 13 small pads.
    id_slab = _stack_and_pad([x_id])
    two_slab = _stack_and_pad([x_gender, x_da_gender, x_facial_hair,
                               x_da_facial_hair, x_spectacles, x_da_spectacles])
    three_slab = _stack_and_pad([x_emotion, x_da_emotion, x_pose, x_da_pose,
                                 x_occlusion, x_da_occlusion])
    logits_stack = jnp.concatenate([id_slab, two_slab, three_slab], axis=0)

    # Labels: one gather + transpose -> [H, B, 1]
    labels_stack = y.astype(jnp.int32)[:, _HEAD_LABEL_COLS].T[:, :, None]

    # Static alpha table (baked constant under jit).
    alpha_stack = _build_alpha_stack(alphas)

    losses = focal_losses_pallas(logits_stack, labels_stack, alpha_stack)

    (loss_id, loss_gender, loss_da_gender, loss_facial_hair,
     loss_da_facial_hair, loss_spectacles, loss_da_spectacles,
     loss_emotion, loss_da_emotion, loss_pose, loss_da_pose,
     loss_occlusion, loss_da_occlusion) = [losses[i] for i in range(NUM_HEADS)]

    total_loss = (loss_id
                  + loss_gender * loss_weight['loss_gender_weight']
                  + loss_da_gender * loss_weight['loss_da_gender_weight']
                  + loss_emotion * loss_weight['loss_emotion_weight']
                  + loss_da_emotion * loss_weight['loss_da_emotion_weight']
                  + loss_pose * loss_weight['loss_pose_weight']
                  + loss_da_pose * loss_weight['loss_da_pose_weight']
                  + loss_facial_hair * loss_weight['loss_facial_hair_weight']
                  + loss_da_facial_hair * loss_weight['loss_da_facial_hair_weight']
                  + loss_occlusion * loss_weight['loss_occlusion_weight']
                  + loss_da_occlusion * loss_weight['loss_da_occlusion_weight']
                  + loss_spectacles * loss_weight['loss_spectacles_weight']
                  + loss_da_spectacles * loss_weight['loss_da_spectacles_weight'])

    return (total_loss, loss_id, loss_gender, loss_da_gender, loss_emotion,
            loss_da_emotion, loss_pose, loss_da_pose, loss_facial_hair,
            loss_da_facial_hair, loss_occlusion, loss_da_occlusion,
            loss_spectacles, loss_da_spectacles)


# Pure-JAX reference focal loss (sanity check).
def _ref_focal(x, lbl, alpha):
    logp = jax.nn.log_softmax(x.astype(jnp.float32), axis=-1)
    logpt = jnp.take_along_axis(logp, lbl[:, None].astype(jnp.int32), axis=1)[:, 0]
    pt = jnp.exp(logpt)
    a_t = jnp.asarray(alpha, jnp.float32)[lbl]
    return jnp.mean(-a_t * (1.0 - pt) ** GAMMA * logpt)


if __name__ == "__main__":
    B = 8
    NUM_IDS = 32

    # per-class focal alphas from the module's dicts
    alphas = {
        'id': [1.0] * NUM_IDS,              # TODO(synk): metadata-derived
        'gender': [0.0, 2.0],
        'spectacles': [1.0, 0.0],
        'facial_hair': [1.0, 0.0],
        'pose': [2.0, 0.25, 0.0],
        'occlusion': [0.0, 0.1, 2.0],
        'emotion': [2.0, 0.25, 0.0],
    }
    loss_weight = {
        'loss_spectacles_weight': 1.0, 'loss_da_spectacles_weight': 0.5,
        'loss_occlusion_weight': 1.0, 'loss_da_occlusion_weight': 0.5,
        'loss_facial_hair_weight': 1.0, 'loss_da_facial_hair_weight': 0.5,
        'loss_pose_weight': 1.0, 'loss_da_pose_weight': 0.5,
        'loss_gender_weight': 1.0, 'loss_da_gender_weight': 0.5,
        'loss_emotion_weight': 1.0, 'loss_da_emotion_weight': 0.5,
    }

    key = jax.random.PRNGKey(0)
    keys = jax.random.split(key, 20)
    mk = lambda k, c: jax.random.normal(k, (B, c), jnp.float32)

    x_spectacles, x_da_spectacles = mk(keys[0], 2), mk(keys[1], 2)
    x_occlusion, x_da_occlusion = mk(keys[2], 3), mk(keys[3], 3)
    x_facial_hair, x_da_facial_hair = mk(keys[4], 2), mk(keys[5], 2)
    x_pose, x_da_pose = mk(keys[6], 3), mk(keys[7], 3)
    x_emotion, x_da_emotion = mk(keys[8], 3), mk(keys[9], 3)
    x_gender, x_da_gender = mk(keys[10], 2), mk(keys[11], 2)
    x_id = mk(keys[12], NUM_IDS)

    y = jnp.stack([
        jax.random.randint(keys[13], (B,), 0, NUM_IDS),   # id
        jax.random.randint(keys[14], (B,), 0, 2),         # gender
        jax.random.randint(keys[15], (B,), 0, 2),         # spectacles
        jax.random.randint(keys[16], (B,), 0, 2),         # facial hair
        jax.random.randint(keys[17], (B,), 0, 3),         # pose
        jax.random.randint(keys[18], (B,), 0, 3),         # occlusion
        jax.random.randint(keys[19], (B,), 0, 3),         # emotion
    ], axis=1).astype(jnp.int32)

    logits = ((x_spectacles, x_da_spectacles), (x_occlusion, x_da_occlusion),
              (x_facial_hair, x_da_facial_hair), (x_pose, x_da_pose),
              (x_emotion, x_da_emotion), (x_gender, x_da_gender), x_id)

    fwd = jax.jit(lambda lg, yy: multi_task_loss(lg, yy, loss_weight, alphas))
    out = jax.block_until_ready(fwd(logits, y))

    # ----- sanity check against a pure-JAX reference (module output order) ----
    refs = [
        _ref_focal(x_id, y[:, 0], alphas['id']),
        _ref_focal(x_gender, y[:, 1], alphas['gender']),
        _ref_focal(x_da_gender, y[:, 1], alphas['gender']),
        _ref_focal(x_emotion, y[:, 6], alphas['emotion']),
        _ref_focal(x_da_emotion, y[:, 6], alphas['emotion']),
        _ref_focal(x_pose, y[:, 4], alphas['pose']),
        _ref_focal(x_da_pose, y[:, 4], alphas['pose']),
        _ref_focal(x_facial_hair, y[:, 3], alphas['facial_hair']),
        _ref_focal(x_da_facial_hair, y[:, 3], alphas['facial_hair']),
        _ref_focal(x_occlusion, y[:, 5], alphas['occlusion']),
        _ref_focal(x_da_occlusion, y[:, 5], alphas['occlusion']),
        _ref_focal(x_spectacles, y[:, 2], alphas['spectacles']),
        _ref_focal(x_da_spectacles, y[:, 2], alphas['spectacles']),
    ]
    ref_total = (refs[0]
                 + refs[1] * loss_weight['loss_gender_weight']
                 + refs[2] * loss_weight['loss_da_gender_weight']
                 + refs[3] * loss_weight['loss_emotion_weight']
                 + refs[4] * loss_weight['loss_da_emotion_weight']
                 + refs[5] * loss_weight['loss_pose_weight']
                 + refs[6] * loss_weight['loss_da_pose_weight']
                 + refs[7] * loss_weight['loss_facial_hair_weight']
                 + refs[8] * loss_weight['loss_da_facial_hair_weight']
                 + refs[9] * loss_weight['loss_occlusion_weight']
                 + refs[10] * loss_weight['loss_da_occlusion_weight']
                 + refs[11] * loss_weight['loss_spectacles_weight']
                 + refs[12] * loss_weight['loss_da_spectacles_weight'])

    for got, want in zip(out[1:], refs):
        assert jnp.allclose(got, want, atol=1e-5, rtol=1e-5), (got, want)
    assert jnp.allclose(out[0], ref_total, atol=1e-5, rtol=1e-5), (out[0], ref_total)

    print("KERNEL_OK")
</pallas_src>

<mosaic_0001>
module attributes {stable_mosaic.version = 11 : i64} {
  func.func @focal_loss_kernel(%arg0: i32, %arg1: memref<13x8x128xf32, #tpu.memory_space<vmem>>, %arg2: memref<13x8x1xi32, #tpu.memory_space<vmem>>, %arg3: memref<13x1x128xf32, #tpu.memory_space<vmem>>, %arg4: memref<13x1x128xf32, #tpu.memory_space<vmem>>) attributes {dimension_semantics = [#tpu.dimension_semantics<arbitrary>], iteration_bounds = array<i64: 1>, scalar_prefetch = 0 : i64, scratch_operands = 0 : i64, tpu.core_type = #tpu.core_type<tc>, window_params = [{pipeline_mode = #tpu.pipeline_mode<synchronous>, transform_indices = @transform_0, window_bounds = array<i64: 13, 8, 128>}, {pipeline_mode = #tpu.pipeline_mode<synchronous>, transform_indices = @transform_1, window_bounds = array<i64: 13, 8, 1>}, {pipeline_mode = #tpu.pipeline_mode<synchronous>, transform_indices = @transform_2, window_bounds = array<i64: 13, 1, 128>}, {pipeline_mode = #tpu.pipeline_mode<synchronous>, transform_indices = @transform_3, window_bounds = array<i64: 13, 1, 128>}]} {
    %c0 = arith.constant 0 : index
    %c0_0 = arith.constant 0 : index
    %c0_1 = arith.constant 0 : index
    %0 = vector.load %arg1[%c0, %c0_0, %c0_1] : memref<13x8x128xf32, #tpu.memory_space<vmem>>, vector<13x8x128xf32>
    %c0_2 = arith.constant 0 : index
    %c0_3 = arith.constant 0 : index
    %c0_4 = arith.constant 0 : index
    %1 = vector.load %arg2[%c0_2, %c0_3, %c0_4] : memref<13x8x1xi32, #tpu.memory_space<vmem>>, vector<13x8x1xi32>
    %c0_5 = arith.constant 0 : index
    %c0_6 = arith.constant 0 : index
    %c0_7 = arith.constant 0 : index
    %2 = vector.load %arg3[%c0_5, %c0_6, %c0_7] : memref<13x1x128xf32, #tpu.memory_space<vmem>>, vector<13x1x128xf32>
    %cst = arith.constant dense<0xFF800000> : vector<13x8xf32>
    %3 = vector.multi_reduction <maximumf>, %0, %cst [2] : vector<13x8x128xf32> to vector<13x8xf32>
    %4 = vector.shape_cast %3 : vector<13x8xf32> to vector<13x8x1xf32>
    %5 = vector.broadcast %4 : vector<13x8x1xf32> to vector<13x8x128xf32>
    %6 = arith.subf %0, %5 : vector<13x8x128xf32>
    %7 = math.exp %6 : vector<13x8x128xf32>
    %cst_8 = arith.constant dense<0.000000e+00> : vector<13x8xf32>
    %8 = vector.multi_reduction <add>, %7, %cst_8 [2] : vector<13x8x128xf32> to vector<13x8xf32>
    %9 = vector.shape_cast %8 : vector<13x8xf32> to vector<13x8x1xf32>
    %10 = tpu.iota {dimensions = array<i32: 2>} : vector<13x8x128xi32>
    %11 = vector.broadcast %1 : vector<13x8x1xi32> to vector<13x8x128xi32>
    %12 = arith.cmpi eq, %10, %11 : vector<13x8x128xi32>
    %cst_9 = arith.constant 0.000000e+00 : f32
    %13 = vector.broadcast %cst_9 : f32 to vector<13x8x128xf32>
    %14 = arith.select %12, %6, %13 : vector<13x8x128xi1>, vector<13x8x128xf32>
    %cst_10 = arith.constant dense<0.000000e+00> : vector<13x8xf32>
    %15 = vector.multi_reduction <add>, %14, %cst_10 [2] : vector<13x8x128xf32> to vector<13x8xf32>
    %16 = vector.shape_cast %15 : vector<13x8xf32> to vector<13x8x1xf32>
    %cst_11 = arith.constant 0.000000e+00 : f32
    %17 = vector.broadcast %cst_11 : f32 to vector<13x8x128xf32>
    %18 = arith.select %12, %7, %17 : vector<13x8x128xi1>, vector<13x8x128xf32>
    %cst_12 = arith.constant dense<0.000000e+00> : vector<13x8xf32>
    %19 = vector.multi_reduction <add>, %18, %cst_12 [2] : vector<13x8x128xf32> to vector<13x8xf32>
    %20 = vector.shape_cast %19 : vector<13x8xf32> to vector<13x8x1xf32>
    %21 = vector.shape_cast %2 : vector<13x1x128xf32> to vector<13x1x128xf32>
    %22 = vector.broadcast %21 : vector<13x1x128xf32> to vector<13x8x128xf32>
    %cst_13 = arith.constant 0.000000e+00 : f32
    %23 = vector.broadcast %cst_13 : f32 to vector<13x8x128xf32>
    %24 = arith.select %12, %22, %23 : vector<13x8x128xi1>, vector<13x8x128xf32>
    %cst_14 = arith.constant dense<0.000000e+00> : vector<13x8xf32>
    %25 = vector.multi_reduction <add>, %24, %cst_14 [2] : vector<13x8x128xf32> to vector<13x8xf32>
    %26 = vector.shape_cast %25 : vector<13x8xf32> to vector<13x8x1xf32>
    %27 = math.log %9 : vector<13x8x1xf32>
    %28 = arith.subf %16, %27 : vector<13x8x1xf32>
    %29 = arith.divf %20, %9 : vector<13x8x1xf32>
    %cst_15 = arith.constant 1.000000e+00 : f32
    %30 = vector.broadcast %cst_15 : f32 to vector<13x8x1xf32>
    %31 = arith.subf %30, %29 : vector<13x8x1xf32>
    %32 = arith.mulf %31, %31 : vector<13x8x1xf32>
    %cst_16 = arith.constant 0.000000e+00 : f32
    %33 = vector.broadcast %cst_16 : f32 to vector<13x8x1xf32>
    %34 = arith.subf %33, %26 : vector<13x8x1xf32>
    %35 = arith.mulf %34, %32 : vector<13x8x1xf32>
    %36 = arith.mulf %35, %28 : vector<13x8x1xf32>
    %cst_17 = arith.constant dense<0.000000e+00> : vector<13x1xf32>
    %37 = vector.multi_reduction <add>, %36, %cst_17 [1] : vector<13x8x1xf32> to vector<13x1xf32>
    %38 = vector.shape_cast %37 : vector<13x1xf32> to vector<13x1x1xf32>
    %cst_18 = arith.constant 1.250000e-01 : f32
    %39 = vector.broadcast %cst_18 : f32 to vector<13x1x1xf32>
    %40 = arith.mulf %38, %39 : vector<13x1x1xf32>
    %41 = vector.shape_cast %40 : vector<13x1x1xf32> to vector<13x1x1xf32>
    %42 = vector.broadcast %41 : vector<13x1x1xf32> to vector<13x1x128xf32>
    %c0_19 = arith.constant 0 : index
    %c0_20 = arith.constant 0 : index
    %c0_21 = arith.constant 0 : index
    %43 = vector.load %arg4[%c0_19, %c0_20, %c0_21] : memref<13x1x128xf32, #tpu.memory_space<vmem>>, vector<13x1x128xf32>
    tpu.vector_store %arg4[%c0_19, %c0_20, %c0_21], %42 {strides = array<i32>} : memref<13x1x128xf32, #tpu.memory_space<vmem>>, vector<13x1x128xf32>,
    return
  }
  func.func @transform_0(%arg0: i32) -> (i32, i32, i32) {
    %c0_i32 = arith.constant 0 : i32
    %c0_i32_0 = arith.constant 0 : i32
    %c0_i32_1 = arith.constant 0 : i32
    %c0_i32_2 = arith.constant 0 : i32
    return %c0_i32, %c0_i32_0, %c0_i32_1 : i32, i32, i32
  }
  func.func @transform_1(%arg0: i32) -> (i32, i32, i32) {
    %c0_i32 = arith.constant 0 : i32
    %c0_i32_0 = arith.constant 0 : i32
    %c0_i32_1 = arith.constant 0 : i32
    %c0_i32_2 = arith.constant 0 : i32
    return %c0_i32, %c0_i32_0, %c0_i32_1 : i32, i32, i32
  }
  func.func @transform_2(%arg0: i32) -> (i32, i32, i32) {
    %c0_i32 = arith.constant 0 : i32
    %c0_i32_0 = arith.constant 0 : i32
    %c0_i32_1 = arith.constant 0 : i32
    %c0_i32_2 = arith.constant 0 : i32
    return %c0_i32, %c0_i32_0, %c0_i32_1 : i32, i32, i32
  }
  func.func @transform_3(%arg0: i32) -> (i32, i32, i32) {
    %c0_i32 = arith.constant 0 : i32
    %c0_i32_0 = arith.constant 0 : i32
    %c0_i32_1 = arith.constant 0 : i32
    %c0_i32_2 = arith.constant 0 : i32
    return %c0_i32, %c0_i32_0, %c0_i32_1 : i32, i32, i32
  }
}

</mosaic_0001>

<bundles_post_ra>
// kernel: _lambda_.1
= control target key start
LH: loop header
LB: loop body
LE: loop exit
PB: predicated region body
PF: predicated region fallthrough
CT: control target
= control target key end

     0   :  { %v725_v2 = vmov 0   ;;  %v144_v47 = vlaneseq  ;;  %s1255_s0 = inlined_call_operand.vmem [shape: f32[13,8,128], index: 0, kind: input, shape index: {}]   ;;  %s1256_s1 = inlined_call_operand.vmem [shape: s32[13,8,1], index: 1, kind: input, shape index: {}]   ;;  %s1257_s2 = inlined_call_operand.vmem [shape: f32[13,1,128], index: 2, kind: input, shape index: {}]   ;;  %s1258_s3 = inlined_call_operand.vmem [shape: f32[13,1,128], index: 3, kind: output, shape index: {}]  }
   0x1   :  { %v16_v0 = vld [vmem:[%s1255_s0 + $0x10] sm:$0xff]  ;;  %v14_v1 = vld [vmem:[%s1255_s0] sm:$0xff]  ;;  %646 = vset.pattern.permute.xlu1 %v725_v2  ;;  %645 = vset.pattern.permute.xlu0 %v725_v2  ;;  %v755_v3 = vld [vmem:[%s1255_s0 + $0x18] sm:$0xff] }
   0x2   :  { %57 = vmax.xlane.f32.xlu1 %v16_v0  ;;  %53 = vmax.xlane.f32.xlu0 %v14_v1  ;;  %v760_v4 = vld [vmem:[%s1255_s0 + $0x8] sm:$0xff]  ;;  %v18_v6 = vld [vmem:[%s1255_s0 + $0x20] sm:$0xff]  ;;  %v776_v7 = vld [vmem:[%s1255_s0 + $0x38] sm:$0xff]  ;;  %v873_v54 = vand.u32 127, %v144_v47 }
   0x3   :  { %v767_v5 = vld [vmem:[%s1255_s0 + $0x28] sm:$0xff]  ;;  %v20_v8 = vld [vmem:[%s1255_s0 + $0x30] sm:$0xff]  ;;  %v22_v10 = vld [vmem:[%s1255_s0 + $0x40] sm:$0xff] }
   0x4   :  { %v785_v9 = vld [vmem:[%s1255_s0 + $0x48] sm:$0xff]  ;;  %v794_v11 = vld [vmem:[%s1255_s0 + $0x58] sm:$0xff]  ;;  %v799_v12 = vld [vmem:[%s1255_s0 + $0x50] sm:$0xff] }
   0x5   :  { %v806_v13 = vld [vmem:[%s1255_s0 + $0x60] sm:$0xff]  ;;  %v28_v14 = vld [vmem:[%s1256_s1 + $0x8] sm:$0xff]  ;;  %v29_v15 = vld [vmem:[%s1256_s1 + $0x10] sm:$0xff] }
   0x6   :  { %59 = vmax.xlane.f32.xlu1 %v755_v3  ;;  %55 = vmax.xlane.f32.xlu0 %v760_v4  ;;  %v30_v16 = vld [vmem:[%s1256_s1 + $0x18] sm:$0xff]  ;;  %v27_v17 = vld [vmem:[%s1256_s1] sm:$0xff]  ;;  %v36_v19 = vld [vmem:[%s1256_s1 + $0x48] sm:$0xff] }
   0x7   :  { %v31_v18 = vld [vmem:[%s1256_s1 + $0x20] sm:$0xff]  ;;  %v32_v20 = vld [vmem:[%s1256_s1 + $0x28] sm:$0xff]  ;;  %v38_v21 = vld [vmem:[%s1256_s1 + $0x58] sm:$0xff] }
   0x8   :  { %v33_v22 = vld [vmem:[%s1256_s1 + $0x30] sm:$0xff]  ;;  %v34_v23 = vld [vmem:[%s1256_s1 + $0x38] sm:$0xff]  ;;  %v35_v24 = vld [vmem:[%s1256_s1 + $0x40] sm:$0xff] }
   0x9   :  { %v37_v25 = vld [vmem:[%s1256_s1 + $0x50] sm:$0xff]  ;;  %v39_v26 = vld [vmem:[%s1256_s1 + $0x60] sm:$0xff] }
   0xa   :  { %63 = vmax.xlane.f32.xlu1 %v767_v5  ;;  %61 = vmax.xlane.f32.xlu0 %v18_v6 }
   0xe   :  { %67 = vmax.xlane.f32.xlu1 %v776_v7  ;;  %65 = vmax.xlane.f32.xlu0 %v20_v8 }
  0x12   :  { %71 = vmax.xlane.f32.xlu1 %v785_v9  ;;  %69 = vmax.xlane.f32.xlu0 %v22_v10 }
  0x16   :  { %75 = vmax.xlane.f32.xlu1 %v794_v11  ;;  %73 = vmax.xlane.f32.xlu0 %v799_v12 }
  0x1a   :  { %77 = vmax.xlane.f32.xlu0 %v806_v13 }
  0x27   :  { %150 = vperm.xlu1 %646, %v28_v14  }
  0x2b   :  { %153 = vperm.xlu1 %646, %v29_v15  }
  0x2f   :  { %156 = vperm.xlu1 %646, %v30_v16  }
  0x30   :  { %147 = vperm.xlu0 %645, %v27_v17  }
  0x33   :  { %159 = vperm.xlu1 %646, %v31_v18  }
  0x34   :  { %174 = vperm.xlu0 %645, %v36_v19  }
  0x37   :  { %162 = vperm.xlu1 %646, %v32_v20  }
  0x38   :  { %180 = vperm.xlu0 %645, %v38_v21  }
  0x3b   :  { %165 = vperm.xlu1 %646, %v33_v22  }
  0x3f   :  { %168 = vperm.xlu1 %646, %v34_v23  }
  0x43   :  { %171 = vperm.xlu1 %646, %v35_v24  }
  0x47   :  { %177 = vperm.xlu1 %646, %v37_v25  }
  0x4b   :  { %183 = vperm.xlu1 %646, %v39_v26  }
  0x8f   :  { %v58_v27 = vpop.xlane.xlu1 %57  ;;  %v54_v28 = vpop.xlane.xlu0 %53 }
  0x90   :  { %v848_v29 = vsub.f32 %v16_v0, %v58_v27  ;;  %v850_v30 = vsub.f32 %v14_v1, %v54_v28 }
  0x92   :  { %v92_v31 = vmul.f32 1.442695, %v850_v30  ;;  %v96_v32 = vmul.f32 1.442695, %v848_v29 }
  0x93   :  { %v60_v33 = vpop.xlane.xlu1 %59  ;;  %v56_v34 = vpop.xlane.xlu0 %55 }
  0x94   :  { %647 = vpow2.f32 %v92_v31  ;;  %v80_v50 = vsub.f32 %v760_v4, %v56_v34  ;;  %v877_v57 = vsub.f32 %v755_v3, %v60_v33  ;;  %v631_v4 = vld [vmem:[%s1257_s2] ss:$0 sm:$0xff] }
  0x95   :  { %649 = vpow2.f32 %v96_v32 }
  0x96   :  { %v94_v58 = vmul.f32 1.442695, %v80_v50  ;;  %v98_v1 = vmul.f32 1.442695, %v877_v57 }
  0x97   :  { %v64_v35 = vpop.xlane.xlu1 %63  ;;  %v62_v36 = vpop.xlane.xlu0 %61 }
  0x98   :  { %v854_v37 = vsub.f32 %v18_v6, %v62_v36  ;;  %v894_v2 = vsub.f32 %v767_v5, %v64_v35 }
  0x9a   :  { %v100_v38 = vmul.f32 1.442695, %v854_v37 }
  0x9b   :  { %v68_v39 = vpop.xlane.xlu1 %67  ;;  %v66_v40 = vpop.xlane.xlu0 %65 }
  0x9c   :  { %v857_v41 = vsub.f32 %v20_v8, %v66_v40  ;;  %651 = vpow2.f32 %v100_v38  ;;  %v102_v8 = vmul.f32 1.442695, %v894_v2 }
  0x9e   :  { %v104_v42 = vmul.f32 1.442695, %v857_v41  ;;  %v860_v43 = vpop.eup %647 }
  0x9f   :  { %v72_v44 = vpop.xlane.xlu1 %71  ;;  %v70_v45 = vpop.xlane.xlu0 %69  ;;  %118 = vadd.xlane.f32.xlu1 %v860_v43 }
  0xa0   :  { %v863_v46 = vsub.f32 %v22_v10, %v70_v45  ;;  %v865_v48 = vpop.eup %649  ;;  %653 = vpow2.f32 %v104_v42  ;;  %v903_v10 = vsub.f32 %v776_v7, %v68_v39  ;;  %v916_v7 = vsub.f32 %v785_v9, %v72_v44  ;;  %v632_v42 = vld [vmem:[%s1257_s2 + $0x1] ss:$0 sm:$0xff]  ;;  %v634_v45 = vld [vmem:[%s1257_s2 + $0x3] ss:$0 sm:$0xff] }
  0xa2   :  { %v108_v49 = vmul.f32 1.442695, %v863_v46  ;;  %v106_v15 = vmul.f32 1.442695, %v903_v10  ;;  %v110_v19 = vmul.f32 1.442695, %v916_v7 }
  0xa3   :  { %v76_v51 = vpop.xlane.xlu1 %75  ;;  %v74_v52 = vpop.xlane.xlu0 %73  ;;  %122 = vadd.xlane.f32.xlu1 %v865_v48 }
  0xa4   :  { %v871_v53 = vsub.f32 %v799_v12, %v74_v52  ;;  %655 = vpow2.f32 %v108_v49  ;;  %v922_v20 = vsub.f32 %v794_v11, %v76_v51  ;;  %v636_v49 = vld [vmem:[%s1257_s2 + $0x5] ss:$0 sm:$0xff] }
  0xa6   :  { %v112_v55 = vmul.f32 1.442695, %v871_v53  ;;  %v652_v56 = vpop.eup %651  ;;  %v114_v9 = vmul.f32 1.442695, %v922_v20 }
  0xa7   :  { %v879_v59 = vpop.permute.xlu1 %150  ;;  %v78_v60 = vpop.xlane.xlu0 %77  ;;  %126 = vadd.xlane.f32.xlu1 %v652_v56 }
  0xa8   :  { %vm186_vm0 = vcmp.eq.s32.totalorder %v873_v54, %v879_v59  ;;  %v884_v61 = vsub.f32 %v806_v13, %v78_v60  ;;  %657 = vpow2.f32 %v112_v55  ;;  %v638_v55 = vld [vmem:[%s1257_s2 + $0x7] ss:$0 sm:$0xff]  ;;  %v640_v60 = vld [vmem:[%s1257_s2 + $0x9] ss:$0 sm:$0xff] }
  0xa9   :  { %v889_v62 = vsel %vm186_vm0, %v80_v50, 0.0  ;;  %659 = vpow2.f32 %v94_v58 }
  0xaa   :  { %v116_v63 = vmul.f32 1.442695, %v884_v61  ;;  %v654_v0 = vpop.eup %653 }
  0xab   :  { %v896_v3 = vpop.permute.xlu1 %153  ;;  %130 = vadd.xlane.f32.xlu1 %v654_v0 }
  0xac   :  { %661 = vpow2.f32 %v116_v63  ;;  %vm187_vm7 = vcmp.eq.s32.totalorder %v873_v54, %v896_v3  ;;  %v641_v3 = vld [vmem:[%s1257_s2 + $0xa] ss:$0 sm:$0xff] }
  0xad   :  { %663 = vpow2.f32 %v98_v1  ;;  %v239_v44 = vsel %vm187_vm7, %v865_v48, 0.0  ;;  %v642_v1 = vld [vmem:[%s1257_s2 + $0xb] ss:$0 sm:$0xff] }
  0xae   :  { %v656_v6 = vpop.eup %655  ;;  %665 = vpow2.f32 %v102_v8 }
  0xaf   :  { %v905_v12 = vpop.permute.xlu1 %156  ;;  %v907_v13 = vpop.permute.xlu0 %147  ;;  %134 = vadd.xlane.f32.xlu1 %v656_v6  ;;  %667 = vpow2.f32 %v106_v15 }
  0xb0   :  { %vm185_vm1 = vcmp.eq.s32.totalorder %v873_v54, %v907_v13  ;;  %669 = vpow2.f32 %v110_v19  ;;  %vm188_vm8 = vcmp.eq.s32.totalorder %v873_v54, %v905_v12  ;;  %v200_v19 = vsel %vm187_vm7, %v848_v29, 0.0  ;;  %v639_v13 = vld [vmem:[%s1257_s2 + $0x8] ss:$0 sm:$0xff] }
  0xb1   :  { %v354_v5 = vsel %vm185_vm1, %v631_v4, 0.0  ;;  %671 = vpow2.f32 %v114_v9  ;;  %v237_v39 = vsel %vm185_vm1, %v860_v43, 0.0  ;;  %v355_v43 = vsel %vm186_vm0, %v632_v42, 0.0 }
  0xb2   :  { %367 = vadd.xlane.f32.xlu0 %v354_v5  ;;  %v658_v14 = vpop.eup %657  ;;  %v357_v48 = vsel %vm188_vm8, %v634_v45, 0.0  ;;  %v198_v15 = vsel %vm185_vm1, %v850_v30, 0.0 }
  0xb3   :  { %v918_v16 = vpop.permute.xlu1 %159  ;;  %138 = vadd.xlane.f32.xlu1 %v658_v14  ;;  %v660_v17 = vpop.eup %659 }
  0xb4   :  { %v238_v24 = vsel %vm186_vm0, %v660_v17, 0.0  ;;  %vm189_vm2 = vcmp.eq.s32.totalorder %v873_v54, %v918_v16  ;;  %v997_v50 = vpop.permute.xlu0 %174  ;;  %v643_v16 = vld [vmem:[%s1257_s2 + $0xc] ss:$0 sm:$0xff] }
  0xb5   :  { %v241_v26 = vsel %vm189_vm2, %v652_v56, 0.0  ;;  %vm194_vm11 = vcmp.eq.s32.totalorder %v873_v54, %v997_v50 }
  0xb6   :  { %v662_v18 = vpop.eup %661  ;;  %120 = vadd.xlane.f32.xlu0 %v660_v17 }
  0xb7   :  { %v924_v21 = vpop.permute.xlu1 %162  ;;  %142 = vadd.xlane.f32.xlu1 %v662_v18  ;;  %v664_v22 = vpop.eup %663 }
  0xb8   :  { %v666_v11 = vpop.eup %665  ;;  %v240_v47 = vsel %vm188_vm8, %v664_v22, 0.0  ;;  %vm190_vm9 = vcmp.eq.s32.totalorder %v873_v54, %v924_v21  ;;  %v181_v58 = vpop.permute.xlu0 %180 }
  0xb9   :  { %v668_v27 = vpop.eup %667  ;;  %v242_v51 = vsel %vm190_vm9, %v666_v11, 0.0  ;;  %v359_v52 = vsel %vm190_vm9, %v636_v49, 0.0  ;;  %vm196_vm12 = vcmp.eq.s32.totalorder %v873_v54, %v181_v58 }
  0xba   :  { %124 = vadd.xlane.f32.xlu0 %v664_v22  ;;  %v670_v32 = vpop.eup %669  ;;  %v365_v8 = vsel %vm196_vm12, %v642_v1, 0.0  ;;  %v202_v22 = vsel %vm189_vm2, %v854_v37, 0.0 }
  0xbb   :  { %v927_v23 = vpop.permute.xlu1 %165  ;;  %252 = vadd.xlane.f32.xlu1 %v238_v24  ;;  %v672_v35 = vpop.eup %671  ;;  %v246_v63 = vsel %vm194_vm11, %v670_v32, 0.0 }
  0xbc   :  { %vm191_vm3 = vcmp.eq.s32.totalorder %v873_v54, %v927_v23  ;;  %v248_v4 = vsel %vm196_vm12, %v672_v35, 0.0 }
  0xbd   :  { %v243_v31 = vsel %vm191_vm3, %v654_v0, 0.0  ;;  %v363_v0 = vsel %vm194_vm11, %v640_v60, 0.0  ;;  %v204_v9 = vsel %vm191_vm3, %v857_v41, 0.0 }
  0xbe   :  { %128 = vadd.xlane.f32.xlu0 %v666_v11 }
  0xbf   :  { %v934_v25 = vpop.permute.xlu1 %168  ;;  %258 = vadd.xlane.f32.xlu1 %v241_v26 }
  0xc0   :  { %vm192_vm10 = vcmp.eq.s32.totalorder %v873_v54, %v934_v25 }
  0xc1   :  { %v244_v56 = vsel %vm192_vm10, %v668_v27, 0.0  ;;  %v361_v59 = vsel %vm192_vm10, %v638_v55, 0.0 }
  0xc2   :  { %132 = vadd.xlane.f32.xlu0 %v668_v27 }
  0xc3   :  { %v941_v28 = vpop.permute.xlu1 %171  ;;  %262 = vadd.xlane.f32.xlu1 %v243_v31 }
  0xc4   :  { %vm193_vm4 = vcmp.eq.s32.totalorder %v873_v54, %v941_v28 }
  0xc5   :  { %v245_v33 = vsel %vm193_vm4, %v656_v6, 0.0  ;;  %v633_v6 = vld [vmem:[%s1257_s2 + $0x2] ss:$0 sm:$0xff]  ;;  %v362_v29 = vsel %vm193_vm4, %v639_v13, 0.0  ;;  %v206_v24 = vsel %vm193_vm4, %v863_v46, 0.0  ;;  %v201_v46 = vsel %vm188_vm8, %v877_v57, 0.0 }
  0xc6   :  { %136 = vadd.xlane.f32.xlu0 %v670_v32  ;;  %v356_v5 = vsel %vm187_vm7, %v633_v6, 0.0  ;;  %v209_v57 = vsel %vm196_vm12, %v922_v20, 0.0 }
  0xc7   :  { %v951_v34 = vpop.permute.xlu1 %177  ;;  %266 = vadd.xlane.f32.xlu1 %v245_v33 }
  0xc8   :  { %vm195_vm5 = vcmp.eq.s32.totalorder %v873_v54, %v951_v34 }
  0xc9   :  { %v247_v36 = vsel %vm195_vm5, %v658_v14, 0.0  ;;  %v635_v14 = vld [vmem:[%s1257_s2 + $0x4] ss:$0 sm:$0xff]  ;;  %v364_v37 = vsel %vm195_vm5, %v641_v3, 0.0  ;;  %v208_v23 = vsel %vm195_vm5, %v871_v53, 0.0  ;;  %v203_v53 = vsel %vm190_vm9, %v894_v2, 0.0 }
  0xca   :  { %140 = vadd.xlane.f32.xlu0 %v672_v35  ;;  %v358_v17 = vsel %vm189_vm2, %v635_v14, 0.0 }
  0xcb   :  { %v958_v38 = vpop.permute.xlu1 %183  ;;  %270 = vadd.xlane.f32.xlu1 %v247_v36 }
  0xcc   :  { %vm197_vm6 = vcmp.eq.s32.totalorder %v873_v54, %v958_v38 }
  0xcd   :  { %v249_v40 = vsel %vm197_vm6, %v662_v18, 0.0  ;;  %v637_v18 = vld [vmem:[%s1257_s2 + $0x6] ss:$0 sm:$0xff]  ;;  %v366_v41 = vsel %vm197_vm6, %v643_v16, 0.0  ;;  %v210_v11 = vsel %vm197_vm6, %v884_v61, 0.0  ;;  %v207_v61 = vsel %vm194_vm11, %v916_v7, 0.0 }
  0xce   :  { %250 = vadd.xlane.f32.xlu0 %v237_v39  ;;  %v360_v30 = vsel %vm191_vm3, %v637_v18, 0.0 }
  0xcf   :  { %274 = vadd.xlane.f32.xlu1 %v249_v40 }
  0xd2   :  { %254 = vadd.xlane.f32.xlu0 %v239_v44 }
  0xd3   :  { %369 = vadd.xlane.f32.xlu1 %v355_v43 }
  0xd6   :  { %256 = vadd.xlane.f32.xlu0 %v240_v47 }
  0xd7   :  { %373 = vadd.xlane.f32.xlu1 %v357_v48 }
  0xda   :  { %260 = vadd.xlane.f32.xlu0 %v242_v51 }
  0xdb   :  { %377 = vadd.xlane.f32.xlu1 %v359_v52 }
  0xde   :  { %264 = vadd.xlane.f32.xlu0 %v244_v56 }
  0xdf   :  { %381 = vadd.xlane.f32.xlu1 %v361_v59 }
  0xe2   :  { %268 = vadd.xlane.f32.xlu0 %v246_v63 }
  0xe3   :  { %385 = vadd.xlane.f32.xlu1 %v363_v0 }
  0xe6   :  { %272 = vadd.xlane.f32.xlu0 %v248_v4 }
  0xe7   :  { %389 = vadd.xlane.f32.xlu1 %v365_v8 }
  0xea   :  { %371 = vadd.xlane.f32.xlu0 %v356_v5 }
  0xeb   :  { %211 = vadd.xlane.f32.xlu1 %v198_v15 }
  0xee   :  { %375 = vadd.xlane.f32.xlu0 %v358_v17 }
  0xef   :  { %215 = vadd.xlane.f32.xlu1 %v200_v19 }
  0xf2   :  { %379 = vadd.xlane.f32.xlu0 %v360_v30 }
  0xf3   :  { %219 = vadd.xlane.f32.xlu1 %v202_v22 }
  0xf6   :  { %383 = vadd.xlane.f32.xlu0 %v362_v29 }
  0xf7   :  { %223 = vadd.xlane.f32.xlu1 %v204_v9 }
  0xfa   :  { %387 = vadd.xlane.f32.xlu0 %v364_v37 }
  0xfb   :  { %227 = vadd.xlane.f32.xlu1 %v206_v24 }
  0xfe   :  { %391 = vadd.xlane.f32.xlu0 %v366_v41 }
  0xff   :  { %231 = vadd.xlane.f32.xlu1 %v208_v23 }
 0x102   :  { %213 = vadd.xlane.f32.xlu0 %v889_v62  ;;  %v205_v62 = vsel %vm192_vm10, %v903_v10, 0.0 }
 0x103   :  { %235 = vadd.xlane.f32.xlu1 %v210_v11 }
 0x106   :  { %217 = vadd.xlane.f32.xlu0 %v201_v46 }
 0x10a   :  { %221 = vadd.xlane.f32.xlu0 %v203_v53 }
 0x10e   :  { %225 = vadd.xlane.f32.xlu0 %v205_v62 }
 0x112   :  { %229 = vadd.xlane.f32.xlu0 %v207_v61 }
 0x116   :  { %233 = vadd.xlane.f32.xlu0 %v209_v57 }
 0x12c   :  { %v119_v12 = vpop.xlane.xlu1 %118 }
 0x12d   :  { %673 = vrcp.f32 %v119_v12 }
 0x12e   :  { %675 = vlog2.f32 %v119_v12 }
 0x130   :  { %v123_v2 = vpop.xlane.xlu1 %122 }
 0x131   :  { %677 = vlog2.f32 %v123_v2 }
 0x132   :  { %679 = vrcp.f32 %v123_v2 }
 0x134   :  { %v127_v21 = vpop.xlane.xlu1 %126 }
 0x135   :  { %681 = vlog2.f32 %v127_v21 }
 0x136   :  { %683 = vrcp.f32 %v127_v21 }
 0x137   :  { %v674_v51 = vpop.eup %673 }
 0x138   :  { %v131_v26 = vpop.xlane.xlu1 %130  ;;  %v676_v58 = vpop.eup %675 }
 0x139   :  { %v394_v13 = vmul.f32 0.6931472, %v676_v58 }
 0x13b   :  { %v678_v59 = vpop.eup %677 }
 0x13c   :  { %v135_v27 = vpop.xlane.xlu1 %134  ;;  %v680_v63 = vpop.eup %679  ;;  %v398_v24 = vmul.f32 0.6931472, %v678_v59 }
 0x13f   :  { %v1119_v28 = vpop.xlane.xlu0 %367  ;;  %v682_v1 = vpop.eup %681 }
 0x140   :  { %v139_v10 = vpop.xlane.xlu1 %138  ;;  %v684_v6 = vpop.eup %683  ;;  %v484_v29 = vsub.f32 0.0, %v1119_v28  ;;  %v402_v53 = vmul.f32 0.6931472, %v682_v1 }
 0x143   :  { %v121_v25 = vpop.xlane.xlu0 %120 }
 0x144   :  { %v143_v31 = vpop.xlane.xlu1 %142  ;;  %685 = vrcp.f32 %v121_v25 }
 0x145   :  { %687 = vlog2.f32 %v131_v26 }
 0x146   :  { %689 = vrcp.f32 %v131_v26 }
 0x147   :  { %v125_v32 = vpop.xlane.xlu0 %124  ;;  %691 = vlog2.f32 %v135_v27 }
 0x148   :  { %v253_v33 = vpop.xlane.xlu1 %252  ;;  %693 = vlog2.f32 %v139_v10 }
 0x149   :  { %695 = vlog2.f32 %v121_v25 }
 0x14a   :  { %697 = vrcp.f32 %v135_v27 }
 0x14b   :  { %v1121_v34 = vpop.xlane.xlu0 %128  ;;  %699 = vlog2.f32 %v143_v31 }
 0x14c   :  { %v259_v7 = vpop.xlane.xlu1 %258  ;;  %701 = vlog2.f32 %v125_v32 }
 0x14d   :  { %703 = vrcp.f32 %v139_v10  ;;  %v441_v19 = vmul.f32 %v684_v6, %v259_v7 }
 0x14e   :  { %v686_v5 = vpop.eup %685  ;;  %705 = vrcp.f32 %v143_v31 }
 0x14f   :  { %v1123_v35 = vpop.xlane.xlu0 %132  ;;  %v688_v15 = vpop.eup %687  ;;  %707 = vlog2.f32 %v1121_v34  ;;  %v435_v3 = vmul.f32 %v686_v5, %v253_v33  ;;  %v462_v61 = vsub.f32 1.0, %v441_v19 }
 0x150   :  { %v1125_v54 = vpop.xlane.xlu1 %262  ;;  %v690_v18 = vpop.eup %689  ;;  %709 = vrcp.f32 %v125_v32  ;;  %v1163_v2 = vmul.f32 0.6931472, %v688_v15 }
 0x151   :  { %v692_v22 = vpop.eup %691  ;;  %711 = vlog2.f32 %v1123_v35  ;;  %v445_v57 = vmul.f32 %v690_v18, %v1125_v54  ;;  %v459_v27 = vsub.f32 1.0, %v435_v3  ;;  %v475_v59 = vmul.f32 %v462_v61, %v462_v61 }
 0x152   :  { %v694_v37 = vpop.eup %693  ;;  %v1165_v21 = vmul.f32 0.6931472, %v692_v22 }
 0x153   :  { %v1127_v20 = vpop.xlane.xlu0 %136  ;;  %v696_v41 = vpop.eup %695  ;;  %v1170_v33 = vmul.f32 0.6931472, %v694_v37 }
 0x154   :  { %v1129_v36 = vpop.xlane.xlu1 %266  ;;  %v698_v62 = vpop.eup %697  ;;  %713 = vlog2.f32 %v1127_v20  ;;  %v1172_v7 = vmul.f32 0.6931472, %v696_v41 }
 0x155   :  { %v700_v26 = vpop.eup %699  ;;  %715 = vrcp.f32 %v1121_v34  ;;  %v449_v31 = vmul.f32 %v698_v62, %v1129_v36  ;;  %v1177_v36 = vmul.f32 %v459_v27, %v459_v27 }
 0x156   :  { %v702_v25 = vpop.eup %701  ;;  %717 = vrcp.f32 %v1123_v35  ;;  %v1175_v1 = vmul.f32 0.6931472, %v700_v26 }
 0x157   :  { %v1131_v38 = vpop.xlane.xlu0 %140  ;;  %v704_v54 = vpop.eup %703  ;;  %v1179_v5 = vmul.f32 0.6931472, %v702_v25  ;;  %719 = vrcp.f32 %v1127_v20 }
 0x158   :  { %v1133_v39 = vpop.xlane.xlu1 %270  ;;  %v706_v58 = vpop.eup %705  ;;  %721 = vlog2.f32 %v1131_v38 }
 0x159   :  { %v708_v34 = vpop.eup %707  ;;  %v453_v18 = vmul.f32 %v704_v54, %v1133_v39  ;;  %723 = vrcp.f32 %v1131_v38 }
 0x15a   :  { %v710_v15 = vpop.eup %709  ;;  %v1185_v41 = vmul.f32 0.6931472, %v708_v34 }
 0x15b   :  { %v251_v40 = vpop.xlane.xlu0 %250 }
 0x15c   :  { %v1135_v42 = vpop.xlane.xlu1 %274  ;;  %v433_v55 = vmul.f32 %v674_v51, %v251_v40 }
 0x15d   :  { %v457_v19 = vmul.f32 %v706_v58, %v1135_v42  ;;  %v468_v42 = vsub.f32 1.0, %v453_v18 }
 0x15e   :  { %v458_v0 = vsub.f32 1.0, %v433_v55 }
 0x15f   :  { %v255_v44 = vpop.xlane.xlu0 %254  ;;  %v470_v61 = vsub.f32 1.0, %v457_v19 }
 0x160   :  { %v1137_v43 = vpop.xlane.xlu1 %369  ;;  %v437_v8 = vmul.f32 %v680_v63, %v255_v44  ;;  %v471_v17 = vmul.f32 %v458_v0, %v458_v0  ;;  %v464_v63 = vsub.f32 1.0, %v445_v57 }
 0x162   :  { %v460_v9 = vsub.f32 1.0, %v437_v8  ;;  %v497_v23 = vmul.f32 %v484_v29, %v471_v17  ;;  %v466_v17 = vsub.f32 1.0, %v449_v31 }
 0x163   :  { %v1139_v45 = vpop.xlane.xlu0 %256 }
 0x164   :  { %v1141_v47 = vpop.xlane.xlu1 %373  ;;  %v473_v28 = vmul.f32 %v460_v9, %v460_v9  ;;  %v477_v9 = vmul.f32 %v464_v63, %v464_v63  ;;  %v439_v37 = vmul.f32 %v710_v15, %v1139_v45 }
 0x166   :  { %v461_v27 = vsub.f32 1.0, %v439_v37 }
 0x167   :  { %v1143_v48 = vpop.xlane.xlu0 %260 }
 0x168   :  { %v1145_v49 = vpop.xlane.xlu1 %377 }
 0x16b   :  { %v1147_v50 = vpop.xlane.xlu0 %264 }
 0x16c   :  { %v1149_v52 = vpop.xlane.xlu1 %381 }
 0x16f   :  { %v1151_v56 = vpop.xlane.xlu0 %268 }
 0x170   :  { %v1153_v60 = vpop.xlane.xlu1 %385 }
 0x173   :  { %v1155_v4 = vpop.xlane.xlu0 %272 }
 0x174   :  { %v1157_v14 = vpop.xlane.xlu1 %389 }
 0x177   :  { %v372_v30 = vpop.xlane.xlu0 %371 }
 0x178   :  { %v212_v16 = vpop.xlane.xlu1 %211  ;;  %v486_v11 = vsub.f32 0.0, %v372_v30  ;;  %v712_v30 = vpop.eup %711 }
 0x179   :  { %v419_v46 = vsub.f32 %v212_v16, %v394_v13  ;;  %v1189_v62 = vmul.f32 0.6931472, %v712_v30 }
 0x17a   :  { %v499_v40 = vmul.f32 %v486_v11, %v473_v28  ;;  %v479_v11 = vmul.f32 %v466_v17, %v466_v17 }
 0x17b   :  { %v376_v12 = vpop.xlane.xlu0 %375  ;;  %v510_v10 = vmul.f32 %v497_v23, %v419_v46 }
 0x17c   :  { %v216_v32 = vpop.xlane.xlu1 %215  ;;  %v488_v51 = vsub.f32 0.0, %v376_v12 }
 0x17d   :  { %v523_v44 = vrot.slane %v510_v10, 4  ;;  %v421_v55 = vsub.f32 %v216_v32, %v398_v24 }
 0x17e   :  { %v501_v22 = vmul.f32 %v488_v51, %v475_v59  ;;  %v481_v51 = vmul.f32 %v468_v42, %v468_v42 }
 0x17f   :  { %v380_v0 = vpop.xlane.xlu0 %379  ;;  %v524_v6 = vadd.f32 %v523_v44, %v510_v10  ;;  %v512_v8 = vmul.f32 %v499_v40, %v421_v55  ;;  %v485_v55 = vsub.f32 0.0, %v1137_v43 }
 0x180   :  { %v220_v35 = vpop.xlane.xlu1 %219  ;;  %v490_v16 = vsub.f32 0.0, %v380_v0 }
 0x181   :  { %v525_v13 = vrot.slane %v524_v6, 2  ;;  %v535_v29 = vrot.slane %v512_v8, 4  ;;  %v423_v3 = vsub.f32 %v220_v35, %v402_v53  ;;  %v714_v53 = vpop.eup %713  ;;  %v483_v35 = vmul.f32 %v470_v61, %v470_v61 }
 0x182   :  { %v716_v26 = vpop.eup %715  ;;  %v503_v28 = vmul.f32 %v490_v16, %v477_v9  ;;  %v1194_v63 = vmul.f32 0.6931472, %v714_v53 }
 0x183   :  { %v384_v24 = vpop.xlane.xlu0 %383  ;;  %v526_v20 = vadd.f32 %v525_v13, %v524_v6  ;;  %v536_v23 = vadd.f32 %v535_v29, %v512_v8  ;;  %v514_v39 = vmul.f32 %v501_v22, %v423_v3  ;;  %v443_v32 = vmul.f32 %v716_v26, %v1143_v48  ;;  %v718_v44 = vpop.eup %717 }
 0x184   :  { %v224_v46 = vpop.xlane.xlu1 %223  ;;  %v492_v10 = vsub.f32 0.0, %v384_v24  ;;  %v720_v15 = vpop.eup %719  ;;  %v487_v22 = vsub.f32 0.0, %v1141_v47  ;;  %v447_v26 = vmul.f32 %v718_v44, %v1147_v50 }
 0x185   :  { %v527_v57 = vrot.slane %v526_v20, 1  ;;  %v537_v45 = vrot.slane %v536_v23, 2  ;;  %v547_v12 = vrot.slane %v514_v39, 4  ;;  %v425_v25 = vsub.f32 %v224_v46, %v1163_v2  ;;  %v1201_v16 = vpop.eup %721 }
 0x186   :  { %v474_v2 = vmul.f32 %v461_v27, %v461_v27  ;;  %v505_v17 = vmul.f32 %v492_v10, %v479_v11  ;;  %v463_v30 = vsub.f32 1.0, %v443_v32  ;;  %v498_v11 = vmul.f32 %v485_v55, %v1177_v36 }
 0x187   :  { %v388_v31 = vpop.xlane.xlu0 %387  ;;  %v528_v54 = vadd.f32 %v527_v57, %v526_v20  ;;  %v538_v38 = vadd.f32 %v537_v45, %v536_v23  ;;  %v548_v40 = vadd.f32 %v547_v12, %v514_v39  ;;  %v516_v58 = vmul.f32 %v503_v28, %v425_v25  ;;  %v724_v39 = vpop.eup %723 }
 0x188   :  { %v228_v59 = vpop.xlane.xlu1 %227  ;;  %v494_v8 = vsub.f32 0.0, %v388_v31  ;;  %v500_v42 = vmul.f32 %v487_v22, %v474_v2  ;;  %v476_v57 = vmul.f32 %v463_v30, %v463_v30  ;;  %v455_v2 = vmul.f32 %v724_v39, %v1155_v4 }
 0x189   :  { %v601_v0 = vmul.f32 0.125, %v528_v54  ;;  %v539_v34 = vrot.slane %v538_v38, 1  ;;  %v549_v6 = vrot.slane %v548_v40, 2  ;;  %v559_v18 = vrot.slane %v516_v58, 4 }
 0x18a   :  { %v427_v48 = vsub.f32 %v228_v59, %v1165_v21  ;;  %v507_v21 = vmul.f32 %v494_v8, %v481_v51  ;;  %v489_v54 = vsub.f32 0.0, %v1145_v49 }
 0x18b   :  { %v392_v19 = vpop.xlane.xlu0 %391  ;;  %614 = vst [vmem:[%s1258_s3] sm:$0x1] %v601_v0  ;;  %v540_v43 = vadd.f32 %v539_v34, %v538_v38  ;;  %v550_v13 = vadd.f32 %v549_v6, %v548_v40  ;;  %v560_v29 = vadd.f32 %v559_v18, %v516_v58  ;;  %v451_v38 = vmul.f32 %v720_v15, %v1151_v56 }
 0x18c   :  { %v518_v3 = vmul.f32 %v505_v17, %v427_v48  ;;  %v496_v9 = vsub.f32 0.0, %v392_v19  ;;  %v232_v37 = vpop.xlane.xlu1 %231  ;;  %v502_v59 = vmul.f32 %v489_v54, %v476_v57  ;;  %v465_v0 = vsub.f32 1.0, %v447_v26 }
 0x18d   :  { %v603_v24 = vmul.f32 0.125, %v540_v43  ;;  %v551_v20 = vrot.slane %v550_v13, 1  ;;  %v429_v23 = vsub.f32 %v232_v37, %v1170_v33  ;;  %v561_v46 = vrot.slane %v560_v29, 2 }
 0x18e   :  { %v571_v53 = vrot.slane %v518_v3, 4  ;;  %v509_v28 = vmul.f32 %v496_v9, %v483_v35  ;;  %v467_v15 = vsub.f32 1.0, %v451_v38  ;;  %v416_v38 = vmul.f32 0.6931472, %v1201_v16 }
 0x18f   :  { %v214_v61 = vpop.xlane.xlu0 %213  ;;  %616 = vst [vmem:[%s1258_s3 + $0x2] sm:$0x1] %v603_v24  ;;  %v552_v47 = vadd.f32 %v551_v20, %v550_v13  ;;  %v520_v45 = vmul.f32 %v507_v21, %v429_v23  ;;  %v562_v27 = vadd.f32 %v561_v46, %v560_v29  ;;  %v478_v13 = vmul.f32 %v465_v0, %v465_v0 }
 0x190   :  { %v420_v12 = vsub.f32 %v214_v61, %v1172_v7  ;;  %v572_v33 = vadd.f32 %v571_v53, %v518_v3  ;;  %v236_v10 = vpop.xlane.xlu1 %235  ;;  %v480_v24 = vmul.f32 %v467_v15, %v467_v15  ;;  %v469_v20 = vsub.f32 1.0, %v455_v2 }
 0x191   :  { %v605_v36 = vmul.f32 0.125, %v552_v47  ;;  %v583_v25 = vrot.slane %v520_v45, 4  ;;  %v431_v32 = vsub.f32 %v236_v10, %v1175_v1  ;;  %v563_v40 = vrot.slane %v562_v27, 1 }
 0x192   :  { %v511_v31 = vmul.f32 %v498_v11, %v420_v12  ;;  %v573_v51 = vrot.slane %v572_v33, 2  ;;  %v493_v61 = vsub.f32 0.0, %v1153_v60 }
 0x193   :  { %v218_v55 = vpop.xlane.xlu0 %217  ;;  %618 = vst [vmem:[%s1258_s3 + $0x4] sm:$0x1] %v605_v36  ;;  %v584_v50 = vadd.f32 %v583_v25, %v520_v45  ;;  %v522_v44 = vmul.f32 %v509_v28, %v431_v32  ;;  %v564_v34 = vadd.f32 %v563_v40, %v562_v27  ;;  %v495_v40 = vsub.f32 0.0, %v1157_v14 }
 0x194   :  { %v529_v7 = vrot.slane %v511_v31, 4  ;;  %v422_v58 = vsub.f32 %v218_v55, %v1179_v5  ;;  %v574_v1 = vadd.f32 %v573_v51, %v572_v33  ;;  %v491_v5 = vsub.f32 0.0, %v1149_v52 }
 0x195   :  { %v585_v6 = vrot.slane %v584_v50, 2  ;;  %v595_v8 = vrot.slane %v522_v44, 4  ;;  %v607_v17 = vmul.f32 0.125, %v564_v34  ;;  %v506_v27 = vmul.f32 %v493_v61, %v480_v24 }
 0x196   :  { %v530_v49 = vadd.f32 %v529_v7, %v511_v31  ;;  %v513_v56 = vmul.f32 %v500_v42, %v422_v58  ;;  %v575_v18 = vrot.slane %v574_v1, 1  ;;  %v504_v53 = vmul.f32 %v491_v5, %v478_v13 }
 0x197   :  { %v222_v48 = vpop.xlane.xlu0 %221  ;;  %v586_v19 = vadd.f32 %v585_v6, %v584_v50  ;;  %v596_v30 = vadd.f32 %v595_v8, %v522_v44  ;;  %620 = vst [vmem:[%s1258_s3 + $0x6] sm:$0x1] %v607_v17  ;;  %v482_v33 = vmul.f32 %v469_v20, %v469_v20 }
 0x198   :  { %v531_v35 = vrot.slane %v530_v49, 2  ;;  %v541_v43 = vrot.slane %v513_v56, 4  ;;  %v576_v22 = vadd.f32 %v575_v18, %v574_v1  ;;  %v424_v29 = vsub.f32 %v222_v48, %v1185_v41 }
 0x199   :  { %v587_v3 = vrot.slane %v586_v19, 1  ;;  %v597_v4 = vrot.slane %v596_v30, 2 }
 0x19a   :  { %v532_v9 = vadd.f32 %v531_v35, %v530_v49  ;;  %v542_v37 = vadd.f32 %v541_v43, %v513_v56  ;;  %v609_v21 = vmul.f32 0.125, %v576_v22  ;;  %v515_v23 = vmul.f32 %v502_v59, %v424_v29 }
 0x19b   :  { %v226_v39 = vpop.xlane.xlu0 %225  ;;  %v588_v11 = vadd.f32 %v587_v3, %v586_v19  ;;  %v598_v46 = vadd.f32 %v597_v4, %v596_v30  ;;  %v508_v59 = vmul.f32 %v495_v40, %v482_v33 }
 0x19c   :  { %v533_v42 = vrot.slane %v532_v9, 1  ;;  %v543_v52 = vrot.slane %v542_v37, 2  ;;  %622 = vst [vmem:[%s1258_s3 + $0x8] sm:$0x1] %v609_v21  ;;  %v553_v41 = vrot.slane %v515_v23, 4  ;;  %v426_v57 = vsub.f32 %v226_v39, %v1189_v62 }
 0x19d   :  { %v611_v47 = vmul.f32 0.125, %v588_v11  ;;  %v599_v12 = vrot.slane %v598_v46, 1 }
 0x19e   :  { %v534_v45 = vadd.f32 %v533_v42, %v532_v9  ;;  %v544_v26 = vadd.f32 %v543_v52, %v542_v37  ;;  %v554_v28 = vadd.f32 %v553_v41, %v515_v23  ;;  %v517_v10 = vmul.f32 %v504_v53, %v426_v57 }
 0x19f   :  { %v230_v36 = vpop.xlane.xlu0 %229  ;;  %624 = vst [vmem:[%s1258_s3 + $0xa] sm:$0x1] %v611_v47  ;;  %v600_v25 = vadd.f32 %v599_v12, %v598_v46 }
 0x1a0   :  { %v602_v60 = vmul.f32 0.125, %v534_v45  ;;  %v545_v31 = vrot.slane %v544_v26, 1  ;;  %v428_v32 = vsub.f32 %v230_v36, %v1194_v63  ;;  %v555_v54 = vrot.slane %v554_v28, 2 }
 0x1a1   :  { %v565_v62 = vrot.slane %v517_v10, 4  ;;  %v613_v51 = vmul.f32 0.125, %v600_v25 }
 0x1a2   :  { %615 = vst [vmem:[%s1258_s3 + $0x1] sm:$0x1] %v602_v60  ;;  %v546_v55 = vadd.f32 %v545_v31, %v544_v26  ;;  %v519_v50 = vmul.f32 %v506_v27, %v428_v32  ;;  %v556_v7 = vadd.f32 %v555_v54, %v554_v28 }
 0x1a3   :  { %v566_v44 = vadd.f32 %v565_v62, %v517_v10  ;;  %v234_v58 = vpop.xlane.xlu0 %233  ;;  %626 = vst [vmem:[%s1258_s3 + $0xc] sm:$0x1] %v613_v51 }
 0x1a4   :  { %v604_v63 = vmul.f32 0.125, %v546_v55  ;;  %v577_v0 = vrot.slane %v519_v50, 4  ;;  %v430_v16 = vsub.f32 %v234_v58, %v416_v38  ;;  %v557_v34 = vrot.slane %v556_v7, 1 }
 0x1a5   :  { %v567_v14 = vrot.slane %v566_v44, 2 }
 0x1a6   :  { %617 = vst [vmem:[%s1258_s3 + $0x3] sm:$0x1] %v604_v63  ;;  %v578_v1 = vadd.f32 %v577_v0, %v519_v50  ;;  %v521_v6 = vmul.f32 %v508_v59, %v430_v16  ;;  %v558_v49 = vadd.f32 %v557_v34, %v556_v7 }
 0x1a7   :  { %v568_v8 = vadd.f32 %v567_v14, %v566_v44 }
 0x1a8   :  { %v579_v56 = vrot.slane %v578_v1, 2  ;;  %v589_v15 = vrot.slane %v521_v6, 4  ;;  %v606_v2 = vmul.f32 0.125, %v558_v49 }
 0x1a9   :  { %v569_v17 = vrot.slane %v568_v8, 1 }
 0x1aa   :  { %v580_v18 = vadd.f32 %v579_v56, %v578_v1  ;;  %v590_v48 = vadd.f32 %v589_v15, %v521_v6  ;;  %619 = vst [vmem:[%s1258_s3 + $0x5] sm:$0x1] %v606_v2 }
 0x1ab   :  { %v570_v19 = vadd.f32 %v569_v17, %v568_v8 }
 0x1ac   :  { %v581_v35 = vrot.slane %v580_v18, 1  ;;  %v591_v30 = vrot.slane %v590_v48, 2 }
 0x1ad   :  { %v608_v43 = vmul.f32 0.125, %v570_v19 }
 0x1ae   :  { %v582_v13 = vadd.f32 %v581_v35, %v580_v18  ;;  %v592_v5 = vadd.f32 %v591_v30, %v590_v48 }
 0x1af   :  { %621 = vst [vmem:[%s1258_s3 + $0x7] sm:$0x1] %v608_v43 }
 0x1b0   :  { %v610_v22 = vmul.f32 0.125, %v582_v13  ;;  %v593_v29 = vrot.slane %v592_v5, 1 }
 0x1b2   :  { %623 = vst [vmem:[%s1258_s3 + $0x9] sm:$0x1] %v610_v22  ;;  %v594_v3 = vadd.f32 %v593_v29, %v592_v5 }
 0x1b4   :  { %v612_v9 = vmul.f32 0.125, %v594_v3 }
 0x1b6   :  { %625 = vst [vmem:[%s1258_s3 + $0xb] sm:$0x1] %v612_v9 }

</bundles_post_ra>
